<compile_context>
chip_gen: v5e
topology: v5e:2x2
jax: 0.10.0
libtpu: 0.0.40
codegen_flags: <defaults>
</compile_context>

<pallas_src>
import math

import jax
import jax.numpy as jnp
from jax.experimental import pallas as pl
from jax.experimental.pallas import tpu as pltpu


# ----------------------------------------------------------------------------
# helpers
# ----------------------------------------------------------------------------
def _round_up(x, m):
    return ((x + m - 1) // m) * m


def _vmem_config():
    """Return (vmem_limit_bytes, fused_block_bytes) per TPU generation.

    v5e/v6e have 128 MiB VMEM per core -> larger tiles; v7x has 64 MiB.
    Falls back to v7x-safe values if the hardware query is unavailable.
    """
    cap = None
    try:
        info = pltpu.get_tpu_info()
        cap = getattr(info, "vmem_capacity_bytes", None)
    except Exception:
        cap = None
    if cap is not None and cap >= (100 << 20):        # v5e / v6e (128 MiB VMEM)
        return 96 << 20, 16 << 20
    return 48 << 20, 8 << 20                          # v7x-safe defaults


# ----------------------------------------------------------------------------
# Kernel 1: fused "sum of per-channel affine submodules", algebraically folded:
#   out = x * (sum_i w_i[c]) + (sum_i b_i[c])   -- one FMA per element.
# x is laid out (N*C, H*W): the per-(batch,channel) scale/shift is a per-row
# (sublane) value broadcast over lanes.
# ----------------------------------------------------------------------------
def _fused_affine_kernel(x_ref, w_ref, b_ref, o_ref):
    x = x_ref[...].astype(jnp.float32)                 # (br, bl)
    o_ref[...] = (x * w_ref[...] + b_ref[...]).astype(o_ref.dtype)


def fused_affine_add(x, weights, biases, *, max_lane_block=4096):
    """x: (N, C, H, W); weights/biases: (M, C). Returns sum_i(x*w_i + b_i)."""
    N, C, H, W = x.shape
    R, L = N * C, H * W
    x2 = x.reshape(R, L)                               # free (row-major view)

    # Fold the M submodules into a single per-channel scale/shift, expanded to
    # per-row (batch, channel) vectors of shape (R, 1) -- negligible traffic.
    w_sum = jnp.sum(weights.astype(jnp.float32), axis=0)   # (C,)
    b_sum = jnp.sum(biases.astype(jnp.float32), axis=0)    # (C,)
    w_rows = jnp.tile(w_sum, N).reshape(R, 1)
    b_rows = jnp.tile(b_sum, N).reshape(R, 1)

    itemsize = jnp.dtype(x.dtype).itemsize
    sub = max(8, 32 // itemsize)        # min sublane tile: 8 (f32) / 16 (bf16)

    vmem_limit, block_bytes = _vmem_config()

    # Lane block: lane-dense multiple of 128 (edge blocks masked by cdiv grid).
    if L % 128 == 0:
        bl = min(max_lane_block, L)
    else:
        bl = min(max_lane_block, _round_up(L, 128))

    # Row block sized from the VMEM budget (x + out streams, double buffered).
    if R <= sub:
        br = R                                         # full dim is allowed
    else:
        br = (block_bytes // (bl * itemsize)) // sub * sub
        br = max(sub, min(br, _round_up(R, sub)))

    # Guarantee >= 2 grid blocks along a parallel axis so both v7x TensorCores
    # (and hence the chip's full HBM bandwidth) stay active.
    if pl.cdiv(R, br) * pl.cdiv(L, bl) < 2:
        if L > 128:
            bl = _round_up(pl.cdiv(L, 2), 128)
        elif R > sub:
            br = _round_up(pl.cdiv(R, 2), sub)

    grid = (pl.cdiv(R, br), pl.cdiv(L, bl))
    x_spec = pl.BlockSpec((br, bl), lambda i, j: (i, j))
    wb_spec = pl.BlockSpec((br, 1), lambda i, j: (i, 0))

    out = pl.pallas_call(
        _fused_affine_kernel,
        out_shape=jax.ShapeDtypeStruct((R, L), x.dtype),
        grid_spec=pltpu.PrefetchScalarGridSpec(
            num_scalar_prefetch=0,
            grid=grid,
            in_specs=[x_spec, wb_spec, wb_spec],
            out_specs=x_spec,
        ),
        compiler_params=pltpu.CompilerParams(
            dimension_semantics=("parallel", "parallel"),
            vmem_limit_bytes=vmem_limit,
        ),
    )(x2, w_rows, b_rows)

    return out.reshape(N, C, H, W)


# ----------------------------------------------------------------------------
# Kernel 2: generic N-way elementwise sum (fallback for arbitrary submodules).
# Lane-dense tiles, f32 accumulation, no wrapper-side padding in the common
# case (lane width chosen to divide the flattened element count).
# ----------------------------------------------------------------------------
def _addn_kernel(*refs):
    in_refs, out_ref = refs[:-1], refs[-1]
    acc = in_refs[0][...].astype(jnp.float32)
    for r in in_refs[1:]:
        acc = acc + r[...].astype(jnp.float32)
    out_ref[...] = acc.astype(out_ref.dtype)


def pallas_add_n(tensors, *, max_lane_block=2048):
    """Elementwise sum of equally-shaped tensors with a Pallas TPU kernel."""
    assert len(tensors) >= 1
    n = len(tensors)
    shape = tensors[0].shape
    dtype = tensors[0].dtype
    total = math.prod(shape)

    itemsize = jnp.dtype(dtype).itemsize
    sub = max(8, 32 // itemsize)

    vmem_limit, _ = _vmem_config()
    # (n inputs + 1 output) streams, double buffered each.
    per_stream_bytes = max(128 * itemsize * sub, vmem_limit // (2 * (n + 1)))

    # Lane width: multiple of 128 that divides the flattened size (avoids any
    # pad/slice HBM passes); prefer one that leaves >= 2 row blocks for the
    # two v7x TensorCores.
    hi = min(max_lane_block, _round_up(total, 128))
    lw, first_div = 0, 0
    for cand in range(hi, 0, -128):
        if total % cand == 0:
            if first_div == 0:
                first_div = cand
            if total // cand >= 2:
                lw = cand
                break
    padded = False
    if lw == 0:
        lw = first_div
    if lw == 0:
        # TODO(synk): no 128-multiple divides the element count; fall back to a
        # single pad+slice (extra HBM traffic; rare for conv-style shapes).
        lw = min(max_lane_block, 128)
        padded = True

    rows = pl.cdiv(total, lw)
    if rows <= sub:
        br = rows
    else:
        br = (per_stream_bytes // (lw * itemsize)) // sub * sub
        br = max(sub, min(br, _round_up(rows, sub)))
        if pl.cdiv(rows, br) < 2:
            br = _round_up(pl.cdiv(rows, 2), sub)

    padded_total = rows * lw

    def prep(t):
        f = t.reshape(-1)
        if padded:
            f = jnp.pad(f, (0, padded_total - total))
        return f.reshape(rows, lw)

    flat = [prep(t) for t in tensors]

    spec = pl.BlockSpec((br, lw), lambda i: (i, 0))
    out = pl.pallas_call(
        _addn_kernel,
        out_shape=jax.ShapeDtypeStruct((rows, lw), dtype),
        grid_spec=pltpu.PrefetchScalarGridSpec(
            num_scalar_prefetch=0,
            grid=(pl.cdiv(rows, br),),
            in_specs=[spec] * n,
            out_specs=spec,
        ),
        compiler_params=pltpu.CompilerParams(
            dimension_semantics=("parallel",),
            vmem_limit_bytes=vmem_limit,
        ),
    )(*flat)

    flat_out = out.reshape(-1)
    if padded:
        flat_out = flat_out[:total]
    return flat_out.reshape(shape)


# ----------------------------------------------------------------------------
# The `Add` module with deterministic synthetic submodules.
# ----------------------------------------------------------------------------
class ChannelAffine:
    """y = x * w[c] + b[c] on NCHW input (a fixed 1x1 depthwise conv)."""

    def __init__(self, weight, bias):
        self.weight = jnp.asarray(weight, dtype=jnp.float32)   # (C,)
        self.bias = jnp.asarray(bias, dtype=jnp.float32)       # (C,)

    def __call__(self, x):
        C = self.weight.shape[0]
        return x * self.weight.reshape(1, C, 1, 1) + self.bias.reshape(1, C, 1, 1)


class AddPallas:
    """JAX/Pallas equivalent of the PyTorch Add(nn.Module)."""

    def __init__(self, add_modules):
        self.add_modules = list(add_modules)

    def __call__(self, x):
        mods = self.add_modules
        assert len(mods) >= 1
        if x.ndim == 4 and all(isinstance(m, ChannelAffine) for m in mods):
            # Fused fast path: the whole M-way sum folds to one FMA in-kernel;
            # x is read from HBM once and the result written once.
            W = jnp.stack([m.weight for m in mods])   # (M, C)
            B = jnp.stack([m.bias for m in mods])     # (M, C)
            return fused_affine_add(x, W, B)
        # TODO(synk): arbitrary submodules run as plain JAX ops (producing n
        # intermediates in HBM); only the final N-way sum is a Pallas kernel.
        tensors = [m(x) for m in mods]
        return pallas_add_n(tensors)


def make_channel_affine(scale, shift, num_channels):
    w = [scale * (c + 1) for c in range(num_channels)]
    b = [shift for _ in range(num_channels)]
    return ChannelAffine(w, b)


if __name__ == "__main__":
    # Small NCHW input consistent with a conv-style module.
    N, C, H, W = 2, 4, 16, 16
    key = jax.random.PRNGKey(0)
    x = jax.random.normal(key, (N, C, H, W), dtype=jnp.float32)

    add_modules = [
        make_channel_affine(scale=1.0, shift=0.00, num_channels=C),
        make_channel_affine(scale=0.5, shift=0.10, num_channels=C),
        make_channel_affine(scale=-0.25, shift=-0.05, num_channels=C),
    ]

    model = AddPallas(add_modules)

    # Fused Pallas path (single-FMA folded affine sum).
    out = jax.block_until_ready(model(x))

    # Plain-JAX reference (mirrors PyTorch `sum([m(x) for m in modules])`).
    ref = sum(m(x) for m in add_modules)
    assert out.shape == (N, C, H, W)
    assert jnp.allclose(out, ref, atol=1e-5, rtol=1e-5)

    # Also exercise the generic N-way-add kernel (fallback path).
    out_generic = jax.block_until_ready(pallas_add_n([m(x) for m in add_modules]))
    assert jnp.allclose(out_generic, ref, atol=1e-5, rtol=1e-5)

    print("KERNEL_OK")
</pallas_src>

<mosaic_0001>
module attributes {stable_mosaic.version = 11 : i64} {
  func.func @_fused_affine_kernel(%arg0: i32, %arg1: i32, %arg2: memref<8x128xf32, #tpu.memory_space<vmem>>, %arg3: memref<8x1xf32, #tpu.memory_space<vmem>>, %arg4: memref<8x1xf32, #tpu.memory_space<vmem>>, %arg5: memref<8x128xf32, #tpu.memory_space<vmem>>) attributes {dimension_semantics = [#tpu.dimension_semantics<parallel>, #tpu.dimension_semantics<parallel>], iteration_bounds = array<i64: 1, 2>, scalar_prefetch = 0 : i64, scratch_operands = 0 : i64, tpu.core_type = #tpu.core_type<tc>, window_params = [{transform_indices = @transform_0, window_bounds = array<i64: 8, 128>}, {transform_indices = @transform_1, window_bounds = array<i64: 8, 1>}, {transform_indices = @transform_2, window_bounds = array<i64: 8, 1>}, {transform_indices = @transform_3, window_bounds = array<i64: 8, 128>}]} {
    %c0 = arith.constant 0 : index
    %c0_0 = arith.constant 0 : index
    %0 = vector.load %arg2[%c0, %c0_0] : memref<8x128xf32, #tpu.memory_space<vmem>>, vector<8x128xf32>
    %c0_1 = arith.constant 0 : index
    %c0_2 = arith.constant 0 : index
    %1 = vector.load %arg3[%c0_1, %c0_2] : memref<8x1xf32, #tpu.memory_space<vmem>>, vector<8x1xf32>
    %2 = vector.broadcast %1 : vector<8x1xf32> to vector<8x128xf32>
    %3 = arith.mulf %0, %2 : vector<8x128xf32>
    %c0_3 = arith.constant 0 : index
    %c0_4 = arith.constant 0 : index
    %4 = vector.load %arg4[%c0_3, %c0_4] : memref<8x1xf32, #tpu.memory_space<vmem>>, vector<8x1xf32>
    %5 = vector.broadcast %4 : vector<8x1xf32> to vector<8x128xf32>
    %6 = arith.addf %3, %5 : vector<8x128xf32>
    %c0_5 = arith.constant 0 : index
    %c0_6 = arith.constant 0 : index
    %7 = vector.load %arg5[%c0_5, %c0_6] : memref<8x128xf32, #tpu.memory_space<vmem>>, vector<8x128xf32>
    tpu.vector_store %arg5[%c0_5, %c0_6], %6 {strides = array<i32>} : memref<8x128xf32, #tpu.memory_space<vmem>>, vector<8x128xf32>,
    return
  }
  func.func @transform_0(%arg0: i32, %arg1: i32) -> (i32, i32) {
    %c0_i32 = arith.constant 0 : i32
    return %arg0, %arg1 : i32, i32
  }
  func.func @transform_1(%arg0: i32, %arg1: i32) -> (i32, i32) {
    %c0_i32 = arith.constant 0 : i32
    %c0_i32_0 = arith.constant 0 : i32
    return %arg0, %c0_i32 : i32, i32
  }
  func.func @transform_2(%arg0: i32, %arg1: i32) -> (i32, i32) {
    %c0_i32 = arith.constant 0 : i32
    %c0_i32_0 = arith.constant 0 : i32
    return %arg0, %c0_i32 : i32, i32
  }
  func.func @transform_3(%arg0: i32, %arg1: i32) -> (i32, i32) {
    %c0_i32 = arith.constant 0 : i32
    return %arg0, %arg1 : i32, i32
  }
}

</mosaic_0001>

<bundles_post_ra>
// kernel: tpu_custom_call.1
= control target key start
LH: loop header
LB: loop body
LE: loop exit
PB: predicated region body
PF: predicated region fallthrough
CT: control target
= control target key end

     0   :  { %8 = vsyncpa [#allocation3], 0  ;;  %s641_s0 = inlined_call_operand.vmem [shape: f32[8,256], index: 0, kind: input, shape index: {}]   ;;  %s642_s1 = inlined_call_operand.vmem [shape: f32[8,1], index: 1, kind: input, shape index: {}]   ;;  %s643_s2 = inlined_call_operand.vmem [shape: f32[8,1], index: 2, kind: input, shape index: {}]   ;;  %s644_s3 = inlined_call_operand.hbm [shape: f32[8,256], index: 3, kind: output, shape index: {}]  }
   0x1   :  { %10 = vsyncpa [#allocation3 + $0x1], 0  ;;  %s538_s12 = smov 0   ;;  %s540_s13 = smov 0  }
   0x2   :  { %s542_s14 = smov 0   ;;  %s544_s15 = smov 0  }
   0x3   :  { %s546_s16 = smov 0   ;;  %s548_s17 = smov 0  }
   0x4 LB: > { %s367_s18 = sadd.s32 4294967295, %s515_s17   ;;  %s368_s19 = sadd.s32 4294967294, %s515_s17   ;;  %s515_s17 = sphi %s548_s17, %s16_s17   ;;  %s511_s16 = sphi %s546_s16, %s651_s16   ;;  %s507_s15 = sphi %s544_s15, %s650_s15   ;;  %s503_s14 = sphi %s542_s14, %s649_s14   ;;  %s499_s13 = sphi %s540_s13, %s648_s13   ;;  %s495_s12 = sphi %s538_s12, %s647_s12  }
   0x5   : > { %s25_s20 = sadd.s32 1, %s511_s16  ;;  %s117_s21 = sadd.s32 1, %s503_s14 }
   0x6   : > { %p26_p0 = scmp.ge.s32.totalorder %s25_s20, 2  ;;  %p127_p1 = scmp.ne.s32.totalorder %s503_s14, %s499_s13 }
   0x7   : > { %p128_p2 = scmp.eq.s32.totalorder %s367_s18, 1  ;;  %p133_p3 = scmp.ne.s32.totalorder %s499_s13, %s495_s12 }
   0x8   : > { %s653_s20 = smov (%p26_p0, %s25_s20), 0  ;;  %p134_p5 = scmp.eq.s32.totalorder %s368_s19, 1 }
   0x9   : > { %p578_p4 = por %p128_p2, %p127_p1  ;;  %s113_s23 = ssub.s32 %s511_s16, %s653_s20 }
   0xa   : > { %p373_p6 = scmp.ge.s32.totalorder %s515_s17, 1  ;;  %p115_p7 = scmp.eq.s32.totalorder %s113_s23, 0 }
   0xb   : > { %p585_p8 = por %p134_p5, %p133_p3  ;;  %p177_p9 = scmp.lt.s32.totalorder %s515_s17, 3 }
   0xc   : > { %s591_s25 = scalar_select %p115_p7, %s503_s14, %s117_s21  }
   0xd   : > { %p178_p10 = pnand %p373_p6, %p177_p9 }
   0xe   : > { %p214_p11 = scmp.lt.s32.totalorder (!%p178_p10), %s507_s15, 1  ;;  %s209_s4 = sand.u32 (!%p178_p10), 1, %s499_s13  }
   0xf   : > { %181 = sbr.rel (%p178_p10) target bundleno = 150 (0x96), region = 32  ;;  %s374_s6 = sshll.u32 (!%p178_p10), %s209_s4, 3 }
  0x10   : > { %s377_s7 = sshll.u32 (!%p178_p10), %s507_s15, 3  ;;  %s211_s21 = scalar_lea.vmem (!%p178_p10), [#allocation2], %s374_s6 }
  0x11   : > { %s257_s19 = scalar_lea.hbm (!%p178_p10), %s644_s3, %s377_s7  ;;  %s259_s23 = sshll.u32 (!%p178_p10), %s211_s21, 4  ;;  %s260_s23 = int_to_ptr.vmem [resolvable:$true] %s259_s23 }
  0x12   : > { %s261_s26 = sshll.u32 (!%p178_p10), %s257_s19, 4  ;;  %s262_s26 = int_to_ptr.hbm [resolvable:$true] %s261_s26 }
  0x13   : > { %s451_s27 = sshra.s32 (!%p178_p10), %s262_s26, 4  ;;  %s452_s27 = int_to_ptr.hbm [resolvable:$true] %s451_s27 }
  0x14   : > { %v229_v0 = vld [vmem:[%s642_s1] sm:$0xff]  ;;  %v517_v1 = vmov 0   ;;  %s215_s30 = scalar_select %p214_p11, %s507_s15, 1 }
  0x15   : > { %436 = vset.pattern.permute.xlu0 %v517_v1  ;;  %v236_v2 = vld [vmem:[%s643_s2] sm:$0xff]  ;;  %s245_s15 = scalar_lea.sflag [#allocation3], %s209_s4  ;;  %s453_s28 = scalar_lea.hbm %s452_s27, 8 }
  0x16   : > { %232 = vperm.xlu0 %436, %v229_v0   ;;  %s375_s5 = sshll.u32 %s215_s30, 3  ;;  %p454_p12 = scmp.ne.s32.totalorder %s452_s27, %s453_s28 }
  0x17   : > { %s219_s10 = scalar_lea.vmem %s641_s0, %s375_s5  ;;  %s457_s5 = scalar_lea.hbm %s644_s3, 16 }
  0x18   : > { %v228_v4 = vld [vmem:[%s219_s10] sm:$0xff]  ;;  %p455_p13 = pnand %p454_p12, %p578_p4  ;;  %p458_p1 = scmp.lt.s32.totalorder %s452_s27, %s644_s3 }
  0x19   : > { %p459_p2 = scmp.lt.s32.totalorder %s457_s5, %s453_s28 }
  0x1a   : > { %p456_p0 = pneg %p455_p13 }
  0x1b   : > { %p460_p3 = por %p459_p2, %p458_p1 }
  0x1d   : > { %p461_p5 = pnand %p460_p3, %p456_p0 }
  0x1e   : > { %239 = vperm.xlu0 %436, %v236_v2  }
  0x88   : > { %v233_v3 = vpop.permute.xlu0 %232 }
  0x89   : > { %v235_v5 = vmul.f32 %v233_v3, %v228_v4 }
  0x90   : > { %v240_v6 = vpop.permute.xlu0 %239 }
  0x91   : > { %v242_v7 = vadd.f32 %v240_v6, %v235_v5 }
  0x93   : > { %243 = vst [vmem:[%s211_s21] sm:$0xff] %v242_v7 }
  0x94   : > { %464 = shalt.err (!%p461_p5)
}
  0x95   : > { %380 = dma.vmem_to_hbm [thread:$0]  (%p578_p4), %s260_s23, 128, %s262_s26, %s245_s15  }
  0x96 PF: > { %p386_p6 = scmp.ge.s32.totalorder %s515_s17, 2  ;;  %s273_s4 = sand.u32 1, %s495_s12  }
  0x97   : > { %s274_s8 = scalar_lea.sflag [#allocation3], %s273_s4 }
  0x98   : > { %p383_p7 = pnand %p386_p6, %p585_p8 }
  0x9a   : > { %p384_p9 = pneg %p383_p7 }
  0x9c   : > { %490 = dma.done.wait (%p384_p9), %s274_s8, 128  }
  0x9d   : > { %492 = vsyncadd (%p384_p9), %s274_s8, 4294967168  ;;  %s16_s17 = sadd.s32 1, %s515_s17   ;;  %s647_s12 = smov %s499_s13 }
  0x9e   : > { %p13_p10 = scmp.ge.s32.totalorder %s16_s17, 4   ;;  %s648_s13 = smov %s503_s14 }
  0x9f   : > { %s649_s14 = smov %s591_s25  ;;  %s650_s15 = smov %s511_s16 }
  0xa0   : > { %s651_s16 = smov %s653_s20  ;;  %15 = sbr.rel (!%p13_p10) target bundleno = 4 (0x4), region = 73 }
  0xa5   :  { %280 = vsyncpa [#allocation3], 1 }
  0xa6   :  { %282 = vsyncpa [#allocation3 + $0x1], 1 }

</bundles_post_ra>
